<compile_context>
chip_gen: v5e
topology: v5e:2x2
jax: 0.10.0
libtpu: 0.0.40
codegen_flags: <defaults>
</compile_context>

<pallas_src>
import jax
import jax.numpy as jnp
from jax.experimental import pallas as pl
from jax.experimental.pallas import tpu as pltpu


# ----------------------------- Pallas kernel -----------------------------

def _mlp_kernel(x_ref, w1_ref, b1_ref, w2_ref, b2_ref, w3r_ref, b3_ref, o_ref):
    f32 = jnp.float32

    # ---- Linear 1: single K = 5*4D dot (bf16 x bf16 -> f32 accumulate).
    h = jnp.dot(x_ref[...], w1_ref[...], preferred_element_type=f32)
    h = jnp.maximum(h + b1_ref[...], 0.0)            # bias + ReLU in f32
    # (dropout == identity in eval mode)

    # ---- Linear 2
    h = jnp.dot(h.astype(w2_ref.dtype), w2_ref[...], preferred_element_type=f32)
    h = jnp.maximum(h + b2_ref[...], 0.0)

    # ---- Linear 3 (out_features = 1): contract against w3 row so the result
    #      lands as a lane-dense [1, TB] row (unmasked full-width stores).
    #      (A VPU mul + cross-lane reduce is an alternative; either way a
    #      small relayout of the [TB, 2D] h is needed, and this dot_general
    #      form is the known-good lowering.)
    y = jax.lax.dot_general(
        w3r_ref[...], h.astype(w3r_ref.dtype),
        dimension_numbers=(((1,), (1,)), ((), ())),
        preferred_element_type=f32)                   # [1, TB]
    o_ref[...] = (y + b3_ref[...]).reshape(o_ref.shape)


def _mlp_pallas(x, w1, b1, w2, b2, w3r, b3, *, block_b=None):
    B, d20 = x.shape
    assert w1.shape[0] == d20

    if block_b is None:
        # Multiple of 128 (lane-dense output row); aim for >=2 tiles at large B
        # (feeds both v7x TensorCores); cap at 4096 so double-buffered blocks
        # stay far under v5e's 16 MiB default scoped-VMEM limit.
        half = -(-B // 2)                              # cdiv(B, 2)
        block_b = max(128, min(4096, ((half + 127) // 128) * 128))
    num_tiles = pl.cdiv(B, block_b)
    # No jnp.pad: the trailing block may read past B; those rows are
    # unspecified but independent and are sliced off by [:B] below.

    def const_spec(shape):
        return pl.BlockSpec(shape, lambda i: (0, 0))   # VMEM-resident weights

    out = pl.pallas_call(
        _mlp_kernel,
        out_shape=jax.ShapeDtypeStruct((num_tiles, 1, block_b), jnp.float32),
        grid=(num_tiles,),
        in_specs=[
            pl.BlockSpec((block_b, d20), lambda i: (i, 0)),
            const_spec(w1.shape), const_spec(b1.shape),
            const_spec(w2.shape), const_spec(b2.shape),
            const_spec(w3r.shape), const_spec(b3.shape),
        ],
        out_specs=pl.BlockSpec((1, 1, block_b), lambda i: (i, 0, 0)),
        compiler_params=pltpu.CompilerParams(
            dimension_semantics=("parallel",)),
    )(x, w1, b1, w2, b2, w3r, b3)
    return out.reshape(-1)[:B]


# ----------------------------- Model wrapper -----------------------------

def init_params(key, user_num, item_num, genre_num, country_num, tags_num,
                output_dim):
    d4, d2, d20 = output_dim * 4, output_dim * 2, output_dim * 20
    ks = jax.random.split(key, 11)
    s = 0.05
    bf16 = jnp.bfloat16
    params = {
        # Embedding tables stored bf16 (cast once here) -> half the gather
        # output traffic, no separate convert pass before the kernel.
        "user_emb":    (jax.random.normal(ks[0], (user_num,    d4), jnp.float32) * s).astype(bf16),
        "item_emb":    (jax.random.normal(ks[1], (item_num,    d4), jnp.float32) * s).astype(bf16),
        "genre_emb":   (jax.random.normal(ks[2], (genre_num,   d4), jnp.float32) * s).astype(bf16),
        "country_emb": (jax.random.normal(ks[3], (country_num, d4), jnp.float32) * s).astype(bf16),
        "tags_emb":    (jax.random.normal(ks[4], (tags_num,    d4), jnp.float32) * s).astype(bf16),
        # Linear weights stored [in, out] (PyTorch stores [out, in]; y = x W^T + b).
        "w1": jax.random.normal(ks[5], (d20, d4), jnp.float32) * s,
        "b1": jax.random.normal(ks[6], (1,   d4), jnp.float32) * s,
        "w2": jax.random.normal(ks[7], (d4,  d2), jnp.float32) * s,
        "b2": jax.random.normal(ks[8], (1,   d2), jnp.float32) * s,
        "w3": jax.random.normal(ks[9], (d2,   1), jnp.float32) * s,
        "b3": jax.random.normal(ks[10], (1,   1), jnp.float32) * s,
    }
    return params


@jax.jit
def simple_cf_forward(params, user, item, genre, country, tags):
    bf16, f32 = jnp.bfloat16, jnp.float32
    # Embedding lookups (bf16 tables); multi-hot sums accumulate in f32.
    user_e    = jnp.take(params["user_emb"],    user,    axis=0)            # [B, 4D] bf16
    item_e    = jnp.take(params["item_emb"],    item,    axis=0)            # [B, 4D] bf16
    genre_e   = jnp.sum(jnp.take(params["genre_emb"], genre, axis=0),
                        axis=1, dtype=f32).astype(bf16)                     # [B, 4D]
    country_e = jnp.take(params["country_emb"], country, axis=0)            # [B, 4D] bf16
    tags_e    = jnp.sum(jnp.take(params["tags_emb"], tags, axis=0),
                        axis=1, dtype=f32).astype(bf16)                     # [B, 4D]

    # One lane-dense [B, 20D] bf16 operand -> single K=20D dot in the kernel.
    x_cat = jnp.concatenate((user_e, item_e, genre_e, country_e, tags_e), -1)

    return _mlp_pallas(
        x_cat,
        params["w1"].astype(bf16), params["b1"],
        params["w2"].astype(bf16), params["b2"],
        params["w3"].T.astype(bf16), params["b3"])                           # [B]


def reference_forward(params, user, item, genre, country, tags):
    f32 = jnp.float32
    user_e    = jnp.take(params["user_emb"],    user,    axis=0).astype(f32)
    item_e    = jnp.take(params["item_emb"],    item,    axis=0).astype(f32)
    genre_e   = jnp.take(params["genre_emb"],   genre,   axis=0).astype(f32).sum(1)
    country_e = jnp.take(params["country_emb"], country, axis=0).astype(f32)
    tags_e    = jnp.take(params["tags_emb"],    tags,    axis=0).astype(f32).sum(1)
    x = jnp.concatenate((user_e, item_e, genre_e, country_e, tags_e), -1)
    x = jnp.maximum(x @ params["w1"] + params["b1"], 0.0)
    x = jnp.maximum(x @ params["w2"] + params["b2"], 0.0)
    x = x @ params["w3"] + params["b3"]
    return x.reshape(-1)


# --------------------------------- Main -----------------------------------

if __name__ == "__main__":
    key = jax.random.PRNGKey(0)
    k_param, k_u, k_i, k_g, k_c, k_t = jax.random.split(key, 6)

    # Small synthetic config.
    user_num, item_num, genre_num, country_num, tags_num = 50, 60, 12, 20, 30
    output_dim = 8
    B, n_genre, n_tags = 8, 3, 5

    params = init_params(k_param, user_num, item_num, genre_num, country_num,
                         tags_num, output_dim)

    user    = jax.random.randint(k_u, (B,),          0, user_num,    jnp.int32)
    item    = jax.random.randint(k_i, (B,),          0, item_num,    jnp.int32)
    genre   = jax.random.randint(k_g, (B, n_genre),  0, genre_num,   jnp.int32)
    country = jax.random.randint(k_c, (B,),          0, country_num, jnp.int32)
    tags    = jax.random.randint(k_t, (B, n_tags),   0, tags_num,    jnp.int32)

    out = simple_cf_forward(params, user, item, genre, country, tags)
    out = jax.block_until_ready(out)

    ref = reference_forward(params, user, item, genre, country, tags)
    assert out.shape == (B,)
    # bf16 matmul operands with f32 accumulation vs f32 reference -> loose tol.
    assert jnp.allclose(out, ref, atol=1e-2, rtol=1e-2), (
        "mismatch vs reference: max abs diff = "
        f"{float(jnp.max(jnp.abs(out - ref)))}")

    print("KERNEL_OK")
</pallas_src>

<mosaic_0001>
module attributes {stable_mosaic.version = 11 : i64} {
  func.func @_mlp_kernel(%arg0: i32, %arg1: memref<128x160xbf16, #tpu.memory_space<vmem>>, %arg2: memref<160x32xbf16, #tpu.memory_space<vmem>>, %arg3: memref<1x32xf32, #tpu.memory_space<vmem>>, %arg4: memref<32x16xbf16, #tpu.memory_space<vmem>>, %arg5: memref<1x16xf32, #tpu.memory_space<vmem>>, %arg6: memref<1x16xbf16, #tpu.memory_space<vmem>>, %arg7: memref<1x1xf32, #tpu.memory_space<vmem>>, %arg8: memref<1x1x128xf32, #tpu.memory_space<vmem>>) attributes {dimension_semantics = [#tpu.dimension_semantics<parallel>], iteration_bounds = array<i64: 1>, scalar_prefetch = 0 : i64, scratch_operands = 0 : i64, tpu.core_type = #tpu.core_type<tc>, window_params = [{transform_indices = @transform_0, window_bounds = array<i64: 128, 160>}, {pipeline_mode = #tpu.pipeline_mode<synchronous>, transform_indices = @transform_1, window_bounds = array<i64: 160, 32>}, {pipeline_mode = #tpu.pipeline_mode<synchronous>, transform_indices = @transform_2, window_bounds = array<i64: 1, 32>}, {pipeline_mode = #tpu.pipeline_mode<synchronous>, transform_indices = @transform_3, window_bounds = array<i64: 32, 16>}, {pipeline_mode = #tpu.pipeline_mode<synchronous>, transform_indices = @transform_4, window_bounds = array<i64: 1, 16>}, {pipeline_mode = #tpu.pipeline_mode<synchronous>, transform_indices = @transform_5, window_bounds = array<i64: 1, 16>}, {pipeline_mode = #tpu.pipeline_mode<synchronous>, transform_indices = @transform_6, window_bounds = array<i64: 1, 1>}, {transform_indices = @transform_7, window_bounds = array<i64: 1, 1, 128>}]} {
    %c0 = arith.constant 0 : index
    %c0_0 = arith.constant 0 : index
    %0 = vector.load %arg1[%c0, %c0_0] : memref<128x160xbf16, #tpu.memory_space<vmem>>, vector<128x160xbf16>
    %c0_1 = arith.constant 0 : index
    %c0_2 = arith.constant 0 : index
    %1 = vector.load %arg2[%c0_1, %c0_2] : memref<160x32xbf16, #tpu.memory_space<vmem>>, vector<160x32xbf16>
    %cst = arith.constant dense<0.000000e+00> : vector<128x32xf32>
    %2 = tpu.matmul %0, %1, %cst {dimension_numbers = #tpu.dot_dimension_numbers<[1], [0], [0], [1], [0, 0, 1, 1], [], []>} : vector<128x160xbf16>, vector<160x32xbf16>, vector<128x32xf32> -> vector<128x32xf32>
    %c0_3 = arith.constant 0 : index
    %c0_4 = arith.constant 0 : index
    %3 = vector.load %arg3[%c0_3, %c0_4] : memref<1x32xf32, #tpu.memory_space<vmem>>, vector<1x32xf32>
    %4 = vector.broadcast %3 : vector<1x32xf32> to vector<128x32xf32>
    %5 = arith.addf %2, %4 : vector<128x32xf32>
    %cst_5 = arith.constant 0.000000e+00 : f32
    %6 = vector.broadcast %cst_5 : f32 to vector<128x32xf32>
    %7 = arith.maximumf %5, %6 : vector<128x32xf32>
    %8 = arith.truncf %7 : vector<128x32xf32> to vector<128x32xbf16>
    %c0_6 = arith.constant 0 : index
    %c0_7 = arith.constant 0 : index
    %9 = vector.load %arg4[%c0_6, %c0_7] : memref<32x16xbf16, #tpu.memory_space<vmem>>, vector<32x16xbf16>
    %cst_8 = arith.constant dense<0.000000e+00> : vector<128x16xf32>
    %10 = tpu.matmul %8, %9, %cst_8 {dimension_numbers = #tpu.dot_dimension_numbers<[1], [0], [0], [1], [0, 0, 1, 1], [], []>} : vector<128x32xbf16>, vector<32x16xbf16>, vector<128x16xf32> -> vector<128x16xf32>
    %c0_9 = arith.constant 0 : index
    %c0_10 = arith.constant 0 : index
    %11 = vector.load %arg5[%c0_9, %c0_10] : memref<1x16xf32, #tpu.memory_space<vmem>>, vector<1x16xf32>
    %12 = vector.broadcast %11 : vector<1x16xf32> to vector<128x16xf32>
    %13 = arith.addf %10, %12 : vector<128x16xf32>
    %cst_11 = arith.constant 0.000000e+00 : f32
    %14 = vector.broadcast %cst_11 : f32 to vector<128x16xf32>
    %15 = arith.maximumf %13, %14 : vector<128x16xf32>
    %c0_12 = arith.constant 0 : index
    %c0_13 = arith.constant 0 : index
    %16 = vector.load %arg6[%c0_12, %c0_13] : memref<1x16xbf16, #tpu.memory_space<vmem>>, vector<1x16xbf16>
    %17 = arith.truncf %15 : vector<128x16xf32> to vector<128x16xbf16>
    %cst_14 = arith.constant dense<0.000000e+00> : vector<1x128xf32>
    %18 = tpu.matmul %16, %17, %cst_14 {dimension_numbers = #tpu.dot_dimension_numbers<[1], [1], [0], [0], [0, 0, 1, 0], [], []>} : vector<1x16xbf16>, vector<128x16xbf16>, vector<1x128xf32> -> vector<1x128xf32>
    %c0_15 = arith.constant 0 : index
    %c0_16 = arith.constant 0 : index
    %19 = vector.load %arg7[%c0_15, %c0_16] : memref<1x1xf32, #tpu.memory_space<vmem>>, vector<1x1xf32>
    %20 = vector.broadcast %19 : vector<1x1xf32> to vector<1x128xf32>
    %21 = arith.addf %18, %20 : vector<1x128xf32>
    %22 = vector.shape_cast %21 : vector<1x128xf32> to vector<1x1x128xf32>
    %c0_17 = arith.constant 0 : index
    %c0_18 = arith.constant 0 : index
    %c0_19 = arith.constant 0 : index
    %23 = vector.load %arg8[%c0_17, %c0_18, %c0_19] : memref<1x1x128xf32, #tpu.memory_space<vmem>>, vector<1x1x128xf32>
    tpu.vector_store %arg8[%c0_17, %c0_18, %c0_19], %22 {strides = array<i32>} : memref<1x1x128xf32, #tpu.memory_space<vmem>>, vector<1x1x128xf32>,
    return
  }
  func.func @transform_0(%arg0: i32) -> (i32, i32) {
    %c0_i32 = arith.constant 0 : i32
    %c0_i32_0 = arith.constant 0 : i32
    return %arg0, %c0_i32 : i32, i32
  }
  func.func @transform_1(%arg0: i32) -> (i32, i32) {
    %c0_i32 = arith.constant 0 : i32
    %c0_i32_0 = arith.constant 0 : i32
    %c0_i32_1 = arith.constant 0 : i32
    return %c0_i32, %c0_i32_0 : i32, i32
  }
  func.func @transform_2(%arg0: i32) -> (i32, i32) {
    %c0_i32 = arith.constant 0 : i32
    %c0_i32_0 = arith.constant 0 : i32
    %c0_i32_1 = arith.constant 0 : i32
    return %c0_i32, %c0_i32_0 : i32, i32
  }
  func.func @transform_3(%arg0: i32) -> (i32, i32) {
    %c0_i32 = arith.constant 0 : i32
    %c0_i32_0 = arith.constant 0 : i32
    %c0_i32_1 = arith.constant 0 : i32
    return %c0_i32, %c0_i32_0 : i32, i32
  }
  func.func @transform_4(%arg0: i32) -> (i32, i32) {
    %c0_i32 = arith.constant 0 : i32
    %c0_i32_0 = arith.constant 0 : i32
    %c0_i32_1 = arith.constant 0 : i32
    return %c0_i32, %c0_i32_0 : i32, i32
  }
  func.func @transform_5(%arg0: i32) -> (i32, i32) {
    %c0_i32 = arith.constant 0 : i32
    %c0_i32_0 = arith.constant 0 : i32
    %c0_i32_1 = arith.constant 0 : i32
    return %c0_i32, %c0_i32_0 : i32, i32
  }
  func.func @transform_6(%arg0: i32) -> (i32, i32) {
    %c0_i32 = arith.constant 0 : i32
    %c0_i32_0 = arith.constant 0 : i32
    %c0_i32_1 = arith.constant 0 : i32
    return %c0_i32, %c0_i32_0 : i32, i32
  }
  func.func @transform_7(%arg0: i32) -> (i32, i32, i32) {
    %c0_i32 = arith.constant 0 : i32
    %c0_i32_0 = arith.constant 0 : i32
    %c0_i32_1 = arith.constant 0 : i32
    return %arg0, %c0_i32, %c0_i32_0 : i32, i32, i32
  }
}

</mosaic_0001>

<bundles_post_ra>
// kernel: simple_cf_forward.1
= control target key start
LH: loop header
LB: loop body
LE: loop exit
PB: predicated region body
PF: predicated region fallthrough
CT: control target
= control target key end

     0   :  { %vm201_vm0 = vcmask 261120   ;;  %vm473_vm1 = vcmask 130048   ;;  %s917_s1 = inlined_call_operand.vmem [shape: bf16[160,32], index: 1, kind: input, shape index: {}]   ;;  %s918_s0 = inlined_call_operand.vmem [shape: bf16[8,160], index: 0, kind: input, shape index: {}]   ;;  %s919_s2 = inlined_call_operand.vmem [shape: f32[1,32], index: 2, kind: input, shape index: {}]   ;;  %s920_s3 = inlined_call_operand.vmem [shape: bf16[32,16], index: 3, kind: input, shape index: {}]   ;;  %s921_s4 = inlined_call_operand.vmem [shape: f32[1,16], index: 4, kind: input, shape index: {}]   ;;  %s922_s6 = inlined_call_operand.<no memory space> [shape: f32[1,1], index: 6, kind: input, shape index: {}]   ;;  %s923_s5 = inlined_call_operand.vmem [shape: bf16[1,16], index: 5, kind: input, shape index: {}]   ;;  %s924_s7 = inlined_call_operand.vmem [shape: f32[1,1,128], index: 7, kind: output, shape index: {}]  }
   0x1   :  { %v671_v0 = vld [vmem:[%s917_s1 + $0x38] sm:$0xff]  ;;  %v673_v1 = vld [vmem:[%s917_s1 + $0x48] sm:$0xff]  ;;  %v670_v2 = vld [vmem:[%s917_s1 + $0x30] sm:$0xff] }
   0x2   :  { %226 = vmatpush.bf16.msra.mxu0 %v671_v0  ;;  %281 = vmatpush.bf16.msra.mxu1 %v673_v1  ;;  %v672_v3 = vld [vmem:[%s917_s1 + $0x40] sm:$0xff]  ;;  %v523_v5 = vld [vmem:[%s918_s0 + $0x8] sm:$0xf0]  ;;  %v667_v9 = vld [vmem:[%s917_s1 + $0x18] sm:$0xff] }
   0x3   :  { %v648_v4 = vld [vmem:[%s918_s0 + $0x4] sm:$0xf]  ;;  %v669_v6 = vld [vmem:[%s917_s1 + $0x28] sm:$0xff]  ;;  %v666_v10 = vld [vmem:[%s917_s1 + $0x10] sm:$0xff] }
   0x4   :  { %v526_v7 = vor.u32 %v648_v4, %v523_v5  ;;  %v668_v8 = vld [vmem:[%s917_s1 + $0x20] sm:$0xff]  ;;  %v650_v11 = vld [vmem:[%s918_s0 + $0x14] sm:$0xf]  ;;  %v531_v12 = vld [vmem:[%s918_s0 + $0x18] sm:$0xf0] }
   0x5   :  { %v665_v13 = vld [vmem:[%s917_s1 + $0x8] sm:$0xff]  ;;  %v534_v14 = vor.u32 %v650_v11, %v531_v12  ;;  %v664_v15 = vld [vmem:[%s917_s1] sm:$0xff]  ;;  %v529_v22 = vld [vmem:[%s918_s0 + $0x10] sm:$0xf] }
   0x6   :  { %227 = vmatpush.bf16.msra.mxu0 %v670_v2  ;;  %282 = vmatpush.bf16.msra.mxu1 %v672_v3  ;;  %v521_v16 = vld [vmem:[%s918_s0] sm:$0xf]  ;;  %v649_v17 = vld [vmem:[%s918_s0 + $0x4] sm:$0xf0]  ;;  %v652_v19 = vld [vmem:[%s918_s0 + $0x24] sm:$0xf] }
   0x7   :  { %v522_v18 = vor.u32 %v649_v17, %v521_v16  ;;  %v539_v20 = vld [vmem:[%s918_s0 + $0x28] sm:$0xf0]  ;;  %v651_v23 = vld [vmem:[%s918_s0 + $0x14] sm:$0xf0]  ;;  %v654_v25 = vld [vmem:[%s918_s0 + $0x34] sm:$0xf] }
   0x8   :  { %v542_v21 = vor.u32 %v652_v19, %v539_v20  ;;  %v530_v24 = vor.u32 %v651_v23, %v529_v22  ;;  %v547_v26 = vld [vmem:[%s918_s0 + $0x38] sm:$0xf0]  ;;  %v537_v28 = vld [vmem:[%s918_s0 + $0x20] sm:$0xf]  ;;  %v653_v29 = vld [vmem:[%s918_s0 + $0x24] sm:$0xf0] }
   0x9   :  { %623 = vmatmul.msk.bf16.vlgmr.msra.gmra.mxu1 %vm201_vm0, %v526_v7  ;;  %v550_v27 = vor.u32 %v654_v25, %v547_v26  ;;  %v538_v30 = vor.u32 %v653_v29, %v537_v28  ;;  %v656_v31 = vld [vmem:[%s918_s0 + $0x44] sm:$0xf]  ;;  %v555_v32 = vld [vmem:[%s918_s0 + $0x48] sm:$0xf0]  ;;  %v545_v34 = vld [vmem:[%s918_s0 + $0x30] sm:$0xf] }
   0xa   :  { %228 = vmatpush.bf16.msra.mxu0 %v669_v6  ;;  %v558_v33 = vor.u32 %v656_v31, %v555_v32  ;;  %v655_v35 = vld [vmem:[%s918_s0 + $0x34] sm:$0xf0]  ;;  %v658_v37 = vld [vmem:[%s918_s0 + $0x54] sm:$0xf]  ;;  %v563_v38 = vld [vmem:[%s918_s0 + $0x58] sm:$0xf0] }
   0xb   :  { %v546_v36 = vor.u32 %v655_v35, %v545_v34  ;;  %v566_v39 = vor.u32 %v658_v37, %v563_v38  ;;  %v553_v40 = vld [vmem:[%s918_s0 + $0x40] sm:$0xf]  ;;  %v657_v41 = vld [vmem:[%s918_s0 + $0x44] sm:$0xf0]  ;;  %v660_v43 = vld [vmem:[%s918_s0 + $0x64] sm:$0xf] }
   0xc   :  { %v554_v42 = vor.u32 %v657_v41, %v553_v40  ;;  %v571_v44 = vld [vmem:[%s918_s0 + $0x68] sm:$0xf0]  ;;  %v561_v46 = vld [vmem:[%s918_s0 + $0x50] sm:$0xf]  ;;  %v659_v47 = vld [vmem:[%s918_s0 + $0x54] sm:$0xf0] }
   0xd   :  { %v574_v45 = vor.u32 %v660_v43, %v571_v44  ;;  %v562_v48 = vor.u32 %v659_v47, %v561_v46  ;;  %v662_v49 = vld [vmem:[%s918_s0 + $0x74] sm:$0xf]  ;;  %v579_v50 = vld [vmem:[%s918_s0 + $0x78] sm:$0xf0]  ;;  %v569_v52 = vld [vmem:[%s918_s0 + $0x60] sm:$0xf] }
   0xe   :  { %229 = vmatpush.bf16.msra.mxu0 %v668_v8  ;;  %v582_v51 = vor.u32 %v662_v49, %v579_v50  ;;  %v661_v53 = vld [vmem:[%s918_s0 + $0x64] sm:$0xf0]  ;;  %v577_v57 = vld [vmem:[%s918_s0 + $0x70] sm:$0xf]  ;;  %v663_v58 = vld [vmem:[%s918_s0 + $0x74] sm:$0xf0] }
   0xf   :  { %v570_v54 = vor.u32 %v661_v53, %v569_v52  ;;  %v675_v55 = vld [vmem:[%s920_s3 + $0x8] sm:$0xff]  ;;  %v674_v59 = vld [vmem:[%s920_s3] sm:$0xff]  ;;  %v578_v60 = vor.u32 %v663_v58, %v577_v57 }
  0x10   :  { %398 = vmatpush.bf16.msra.mxu2 %v675_v55  ;;  %v864_v0 = vld [vmem:[%s919_s2] ss:$0 sm:$0xff] }
  0x12   :  { %230 = vmatpush.bf16.msra.mxu0 %v667_v9 }
  0x14   :  { %399 = vmatpush.bf16.msra.mxu2 %v674_v59 }
  0x16   :  { %231 = vmatpush.bf16.msra.mxu0 %v666_v10 }
  0x19   :  { %624 = vmatmul.msk.bf16.gmra.mxu1 %vm201_vm0, %v534_v14 }
  0x1a   :  { %232 = vmatpush.bf16.msra.mxu0 %v665_v13 }
  0x1e   :  { %233 = vmatpush.bf16.msra.mxu0 %v664_v15 }
  0x21   :  { %234 = vmatmul.bf16.vlgmr.msra.gmra.mxu0 %v522_v18 }
  0x29   :  { %625 = vmatmul.msk.bf16.gmra.mxu1 %vm201_vm0, %v542_v21 }
  0x31   :  { %239 = vmatmul.bf16.gmra.mxu0 %v530_v24 }
  0x39   :  { %626 = vmatmul.msk.bf16.gmra.mxu1 %vm201_vm0, %v550_v27 }
  0x41   :  { %244 = vmatmul.bf16.gmra.mxu0 %v538_v30 }
  0x49   :  { %627 = vmatmul.msk.bf16.gmra.mxu1 %vm201_vm0, %v558_v33 }
  0x51   :  { %249 = vmatmul.bf16.gmra.mxu0 %v546_v36 }
  0x59   :  { %628 = vmatmul.msk.bf16.gmra.mxu1 %vm201_vm0, %v566_v39 }
  0x61   :  { %254 = vmatmul.bf16.gmra.mxu0 %v554_v42 }
  0x69   :  { %629 = vmatmul.msk.bf16.gmra.mxu1 %vm201_vm0, %v574_v45 }
  0x71   :  { %259 = vmatmul.bf16.gmra.mxu0 %v562_v48 }
  0x79   :  { %630 = vmatmul.msk.bf16.gmra.mxu1 %vm201_vm0, %v582_v51 }
  0x81   :  { %264 = vmatmul.bf16.gmra.mxu0 %v570_v54 }
  0x86   :  { %v284_v56 = vpop.f32.mrf.mxu1 }
  0x8e   :  { %v286_v61 = vpop.f32.mrf.mxu1 }
  0x91   :  { %269 = vmatmul.bf16.gmra.mxu0 %v578_v60 }
  0x96   :  { %v289_v62 = vpop.f32.mrf.mxu1 }
  0x9e   :  { %v235_v63 = vpop.f32.mrf.mxu0  ;;  %v291_v1 = vpop.f32.mrf.mxu1 }
  0x9f   :  { %v236_v2 = vadd.f32 %v864_v0, %v235_v63 }
  0xa1   :  { %v285_v4 = vadd.f32 %v284_v56, %v236_v2 }
  0xa3   :  { %v324_v8 = vmax.f32 %v285_v4, 0.0 }
  0xa6   :  { %v237_v3 = vpop.f32.mrf.mxu0  ;;  %v294_v7 = vpop.f32.mrf.mxu1 }
  0xa7   :  { %v238_v5 = vadd.f32 %v864_v0, %v237_v3 }
  0xa9   :  { %v287_v6 = vadd.f32 %v286_v61, %v238_v5 }
  0xab   :  { %v325_v9 = vmax.f32 %v287_v6, 0.0 }
  0xad   :  { %v340_v10 = vpack.c.bf16 %v325_v9, %v324_v8 }
  0xae   :  { %v240_v11 = vpop.f32.mrf.mxu0  ;;  %v296_v13 = vpop.f32.mrf.mxu1 }
  0xaf   :  { %639 = vmatmul.msk.bf16.vlgmr.msra.gmra.mxu2 %vm201_vm0, %v340_v10  ;;  %v241_v12 = vadd.f32 %v864_v0, %v240_v11 }
  0xb1   :  { %v290_v15 = vadd.f32 %v289_v62, %v241_v12 }
  0xb3   :  { %v326_v18 = vmax.f32 %v290_v15, 0.0 }
  0xb6   :  { %v242_v14 = vpop.f32.mrf.mxu0  ;;  %v299_v22 = vpop.f32.mrf.mxu1 }
  0xb7   :  { %v243_v16 = vadd.f32 %v864_v0, %v242_v14 }
  0xb9   :  { %v292_v17 = vadd.f32 %v291_v1, %v243_v16 }
  0xbb   :  { %v327_v19 = vmax.f32 %v292_v17, 0.0 }
  0xbd   :  { %v341_v20 = vpack.c.bf16 %v327_v19, %v326_v18 }
  0xbe   :  { %v245_v21 = vpop.f32.mrf.mxu0  ;;  %v301_v27 = vpop.f32.mrf.mxu1 }
  0xbf   :  { %640 = vmatmul.msk.bf16.gmra.mxu2 %vm201_vm0, %v341_v20  ;;  %v246_v23 = vadd.f32 %v864_v0, %v245_v21 }
  0xc1   :  { %v295_v25 = vadd.f32 %v294_v7, %v246_v23  ;;  %v679_v23 = vld [vmem:[%s921_s4] ss:$0 sm:$0xff] }
  0xc3   :  { %v328_v29 = vmax.f32 %v295_v25, 0.0 }
  0xc6   :  { %v247_v24 = vpop.f32.mrf.mxu0  ;;  %v304_v33 = vpop.f32.mrf.mxu1 }
  0xc7   :  { %v248_v26 = vadd.f32 %v864_v0, %v247_v24 }
  0xc9   :  { %v297_v28 = vadd.f32 %v296_v13, %v248_v26 }
  0xcb   :  { %v329_v30 = vmax.f32 %v297_v28, 0.0 }
  0xcd   :  { %v342_v31 = vpack.c.bf16 %v329_v30, %v328_v29 }
  0xce   :  { %v250_v32 = vpop.f32.mrf.mxu0  ;;  %v306_v41 = vpop.f32.mrf.mxu1 }
  0xcf   :  { %641 = vmatmul.msk.bf16.gmra.mxu2 %vm201_vm0, %v342_v31  ;;  %v251_v34 = vadd.f32 %v864_v0, %v250_v32 }
  0xd1   :  { %v300_v36 = vadd.f32 %v299_v22, %v251_v34 }
  0xd3   :  { %v330_v39 = vmax.f32 %v300_v36, 0.0 }
  0xd6   :  { %v252_v35 = vpop.f32.mrf.mxu0  ;;  %v309_v46 = vpop.f32.mrf.mxu1 }
  0xd7   :  { %v253_v37 = vadd.f32 %v864_v0, %v252_v35 }
  0xd9   :  { %v302_v38 = vadd.f32 %v301_v27, %v253_v37 }
  0xdb   :  { %v331_v40 = vmax.f32 %v302_v38, 0.0 }
  0xdd   :  { %v343_v42 = vpack.c.bf16 %v331_v40, %v330_v39 }
  0xde   :  { %v255_v43 = vpop.f32.mrf.mxu0  ;;  %v311_v54 = vpop.f32.mrf.mxu1 }
  0xdf   :  { %642 = vmatmul.msk.bf16.gmra.mxu2 %vm201_vm0, %v343_v42  ;;  %v256_v44 = vadd.f32 %v864_v0, %v255_v43 }
  0xe1   :  { %v305_v47 = vadd.f32 %v304_v33, %v256_v44 }
  0xe3   :  { %v332_v50 = vmax.f32 %v305_v47, 0.0 }
  0xe6   :  { %v257_v45 = vpop.f32.mrf.mxu0  ;;  %v314_v60 = vpop.f32.mrf.mxu1 }
  0xe7   :  { %v258_v48 = vadd.f32 %v864_v0, %v257_v45 }
  0xe9   :  { %v307_v49 = vadd.f32 %v306_v41, %v258_v48 }
  0xeb   :  { %v333_v51 = vmax.f32 %v307_v49, 0.0 }
  0xed   :  { %v344_v52 = vpack.c.bf16 %v333_v51, %v332_v50 }
  0xee   :  { %v260_v53 = vpop.f32.mrf.mxu0  ;;  %v316_v3 = vpop.f32.mrf.mxu1 }
  0xef   :  { %643 = vmatmul.msk.bf16.gmra.mxu2 %vm201_vm0, %v344_v52  ;;  %v261_v55 = vadd.f32 %v864_v0, %v260_v53 }
  0xf1   :  { %v310_v57 = vadd.f32 %v309_v46, %v261_v55 }
  0xf3   :  { %v334_v61 = vmax.f32 %v310_v57, 0.0 }
  0xf6   :  { %v262_v56 = vpop.f32.mrf.mxu0  ;;  %v319_v11 = vpop.f32.mrf.mxu1 }
  0xf7   :  { %v263_v58 = vadd.f32 %v864_v0, %v262_v56 }
  0xf9   :  { %v312_v59 = vadd.f32 %v311_v54, %v263_v58 }
  0xfb   :  { %v335_v62 = vmax.f32 %v312_v59, 0.0 }
  0xfd   :  { %v345_v63 = vpack.c.bf16 %v335_v62, %v334_v61 }
  0xfe   :  { %v265_v1 = vpop.f32.mrf.mxu0  ;;  %v321_v17 = vpop.f32.mrf.mxu1 }
  0xff   :  { %644 = vmatmul.msk.bf16.gmra.mxu2 %vm201_vm0, %v345_v63  ;;  %v266_v2 = vadd.f32 %v864_v0, %v265_v1 }
 0x101   :  { %v315_v5 = vadd.f32 %v314_v60, %v266_v2 }
 0x103   :  { %v336_v8 = vmax.f32 %v315_v5, 0.0 }
 0x106   :  { %v267_v4 = vpop.f32.mrf.mxu0 }
 0x107   :  { %v268_v6 = vadd.f32 %v864_v0, %v267_v4 }
 0x109   :  { %v317_v7 = vadd.f32 %v316_v3, %v268_v6 }
 0x10b   :  { %v337_v9 = vmax.f32 %v317_v7, 0.0 }
 0x10d   :  { %v346_v10 = vpack.c.bf16 %v337_v9, %v336_v8 }
 0x10e   :  { %v270_v12 = vpop.f32.mrf.mxu0 }
 0x10f   :  { %645 = vmatmul.msk.bf16.gmra.mxu2 %vm201_vm0, %v346_v10  ;;  %v271_v13 = vadd.f32 %v864_v0, %v270_v12 }
 0x111   :  { %v320_v15 = vadd.f32 %v319_v11, %v271_v13 }
 0x113   :  { %v338_v19 = vmax.f32 %v320_v15, 0.0 }
 0x116   :  { %v272_v14 = vpop.f32.mrf.mxu0 }
 0x117   :  { %v273_v16 = vadd.f32 %v864_v0, %v272_v14 }
 0x119   :  { %v322_v18 = vadd.f32 %v321_v17, %v273_v16 }
 0x11b   :  { %v339_v20 = vmax.f32 %v322_v18, 0.0 }
 0x11d   :  { %v347_v21 = vpack.c.bf16 %v339_v20, %v338_v19  ;;  %v12_v20 = vstv %s922_s6 }
 0x11e   :  { %13 = vst [vmem:[#allocation2] sm:$0x1] %v12_v20 }
 0x11f   :  { %646 = vmatmul.msk.bf16.gmra.mxu2 %vm201_vm0, %v347_v21  ;;  %v680_v21 = vmov 0  }
 0x120   :  { %677 = vset.pattern.permute.xlu0 %v680_v21 }
 0x132   :  { %v401_v22 = vpop.f32.mrf.mxu2 }
 0x133   :  { %v402_v24 = vadd.f32 %v679_v23, %v401_v22 }
 0x135   :  { %v441_v27 = vmax.f32 %v402_v24, 0.0 }
 0x13a   :  { %v403_v25 = vpop.f32.mrf.mxu2 }
 0x13b   :  { %v404_v26 = vadd.f32 %v679_v23, %v403_v25 }
 0x13d   :  { %v442_v28 = vmax.f32 %v404_v26, 0.0  ;;  %v457_v26 = vld [vmem:[%s923_s5] sm:$0x1] }
 0x13f   :  { %v893_v29 = vpack.c.bf16 %v442_v28, %v441_v27 }
 0x141   :  { %v478_v25 = vsel %vm473_vm1, %v893_v29, 0 }
 0x142   :  { %v406_v0 = vpop.f32.mrf.mxu2 }
 0x143   :  { %v407_v30 = vadd.f32 %v679_v23, %v406_v0 }
 0x145   :  { %v443_v33 = vmax.f32 %v407_v30, 0.0 }
 0x14a   :  { %v408_v31 = vpop.f32.mrf.mxu2 }
 0x14b   :  { %v409_v32 = vadd.f32 %v679_v23, %v408_v31 }
 0x14d   :  { %v444_v34 = vmax.f32 %v409_v32, 0.0 }
 0x14f   :  { %v895_v35 = vpack.c.bf16 %v444_v34, %v443_v33 }
 0x151   :  { %v481_v24 = vsel %vm473_vm1, %v895_v35, 0 }
 0x152   :  { %v411_v36 = vpop.f32.mrf.mxu2 }
 0x153   :  { %v412_v37 = vadd.f32 %v679_v23, %v411_v36 }
 0x155   :  { %v445_v40 = vmax.f32 %v412_v37, 0.0 }
 0x15a   :  { %v413_v38 = vpop.f32.mrf.mxu2 }
 0x15b   :  { %v414_v39 = vadd.f32 %v679_v23, %v413_v38 }
 0x15d   :  { %v446_v41 = vmax.f32 %v414_v39, 0.0 }
 0x15f   :  { %v460_v42 = vpack.c.bf16 %v446_v41, %v445_v40 }
 0x161   :  { %v484_v22 = vsel %vm473_vm1, %v460_v42, 0 }
 0x162   :  { %v416_v43 = vpop.f32.mrf.mxu2 }
 0x163   :  { %v417_v44 = vadd.f32 %v679_v23, %v416_v43 }
 0x165   :  { %v447_v47 = vmax.f32 %v417_v44, 0.0 }
 0x16a   :  { %v418_v45 = vpop.f32.mrf.mxu2 }
 0x16b   :  { %v419_v46 = vadd.f32 %v679_v23, %v418_v45 }
 0x16d   :  { %v448_v48 = vmax.f32 %v419_v46, 0.0 }
 0x16f   :  { %v461_v49 = vpack.c.bf16 %v448_v48, %v447_v47 }
 0x171   :  { %v487_v19 = vsel %vm473_vm1, %v461_v49, 0 }
 0x172   :  { %v421_v50 = vpop.f32.mrf.mxu2 }
 0x173   :  { %v422_v51 = vadd.f32 %v679_v23, %v421_v50 }
 0x175   :  { %v449_v54 = vmax.f32 %v422_v51, 0.0 }
 0x17a   :  { %v423_v52 = vpop.f32.mrf.mxu2 }
 0x17b   :  { %v424_v53 = vadd.f32 %v679_v23, %v423_v52 }
 0x17d   :  { %v450_v55 = vmax.f32 %v424_v53, 0.0 }
 0x17f   :  { %v462_v56 = vpack.c.bf16 %v450_v55, %v449_v54 }
 0x181   :  { %v490_v18 = vsel %vm473_vm1, %v462_v56, 0 }
 0x182   :  { %v426_v57 = vpop.f32.mrf.mxu2 }
 0x183   :  { %v427_v12 = vadd.f32 %v679_v23, %v426_v57 }
 0x185   :  { %v451_v15 = vmax.f32 %v427_v12, 0.0 }
 0x18a   :  { %v428_v58 = vpop.f32.mrf.mxu2 }
 0x18b   :  { %v429_v10 = vadd.f32 %v679_v23, %v428_v58 }
 0x18d   :  { %v452_v13 = vmax.f32 %v429_v10, 0.0 }
 0x18f   :  { %v463_v16 = vpack.c.bf16 %v452_v13, %v451_v15 }
 0x191   :  { %v493_v17 = vsel %vm473_vm1, %v463_v16, 0 }
 0x192   :  { %v431_v59 = vpop.f32.mrf.mxu2 }
 0x193   :  { %v432_v5 = vadd.f32 %v679_v23, %v431_v59 }
 0x195   :  { %v453_v9 = vmax.f32 %v432_v5, 0.0 }
 0x19a   :  { %v433_v60 = vpop.f32.mrf.mxu2 }
 0x19b   :  { %v434_v2 = vadd.f32 %v679_v23, %v433_v60 }
 0x19d   :  { %v454_v7 = vmax.f32 %v434_v2, 0.0 }
 0x19f   :  { %v464_v11 = vpack.c.bf16 %v454_v7, %v453_v9 }
 0x1a1   :  { %v496_v14 = vsel %vm473_vm1, %v464_v11, 0 }
 0x1a2   :  { %v436_v61 = vpop.f32.mrf.mxu2 }
 0x1a3   :  { %v437_v62 = vadd.f32 %v679_v23, %v436_v61 }
 0x1a5   :  { %v455_v3 = vmax.f32 %v437_v62, 0.0 }
 0x1aa   :  { %v438_v63 = vpop.f32.mrf.mxu2 }
 0x1ab   :  { %v439_v1 = vadd.f32 %v679_v23, %v438_v63  ;;  %v466_v23 = vld [vmem:[#allocation2] sm:$0x1] }
 0x1ac   :  { %469 = vperm.xlu0 %677, %v466_v23  }
 0x1ad   :  { %v456_v4 = vmax.f32 %v439_v1, 0.0 }
 0x1af   :  { %v465_v6 = vpack.c.bf16 %v456_v4, %v455_v3 }
 0x1b1   :  { %v499_v8 = vsel %vm473_vm1, %v465_v6, 0 }
 0x1b2   :  { %501 = vmatpush.bf16.xpose.msra.mxu3 %v499_v8 }
 0x1ba   :  { %502 = vmatpush.bf16.xpose.msra.mxu3 %v496_v14 }
 0x1c2   :  { %503 = vmatpush.bf16.xpose.msra.mxu3 %v493_v17 }
 0x1ca   :  { %504 = vmatpush.bf16.xpose.msra.mxu3 %v490_v18 }
 0x1d2   :  { %505 = vmatpush.bf16.xpose.msra.mxu3 %v487_v19 }
 0x1da   :  { %506 = vmatpush.bf16.xpose.msra.mxu3 %v484_v22 }
 0x1e2   :  { %507 = vmatpush.bf16.xpose.msra.mxu3 %v481_v24 }
 0x1ea   :  { %508 = vmatpush.bf16.xpose.msra.mxu3 %v478_v25 }
 0x1f1   :  { %647 = vmatmul.msk.bf16.vlgmr.msra.gmra.mxu3 %vm473_vm1, %v457_v26 }
 0x21e   :  { %v470_v27 = vpop.permute.xlu0 %469 }
 0x21f   :  { %v472_v28 = vperm.slane %v470_v27, 0 }
 0x274   :  { %v510_v0 = vpop.f32.mrf.mxu3 }
 0x275   :  { %v511_v30 = vadd.f32 %v510_v0, %v472_v28 }
 0x277   :  { %514 = vst [vmem:[%s924_s7] sm:$0x1] %v511_v30 }
 0x27c   :  { %v512_v31 = vpop.f32.mrf.mxu3 }

</bundles_post_ra>
